<compile_context>
chip_gen: v5e
topology: v5e:2x2
jax: 0.10.0
libtpu: 0.0.40
codegen_flags: <defaults>
</compile_context>

<pallas_src>
import jax
import jax.numpy as jnp
from jax.experimental import pallas as pl
from jax.experimental.pallas import tpu as pltpu


_LANE = 128                 # vreg lane width
_TILE_BYTE_BUDGET = 4 << 20  # ~4 MiB per block; 2 operands x 2 bufs = 16 MiB resident
_MIN_GRID_STEPS = 4          # give the "parallel" axis enough steps for v7x megacore


def _copy_kernel(x_ref, o_ref):
    # Identity copy of the current (tile_rows, cols) tile.
    o_ref[...] = x_ref[...]


def _resolve_shape(total, shape):
    """torch.Tensor.view semantics: at most one -1, product must equal numel."""
    shape = tuple(int(s) for s in shape)
    if shape.count(-1) > 1:
        raise ValueError("only one dimension may be inferred (-1)")
    if -1 in shape:
        known = 1
        for s in shape:
            if s != -1:
                if s < 0:
                    raise ValueError(f"invalid shape dimension {s}")
                known *= s
        if known == 0 or total % known != 0:
            raise ValueError(f"cannot view {total} elements as {shape}")
        return tuple(total // known if s == -1 else s for s in shape)
    prod = 1
    for s in shape:
        if s < 0:
            raise ValueError(f"invalid shape dimension {s}")
        prod *= s
    if prod != total:   # also allows zero-sized views of zero-element tensors
        raise ValueError(f"cannot view {total} elements as {shape}")
    return shape


def _cdiv(a, b):
    return -(-a // b)


def _round_up(a, b):
    return _cdiv(a, b) * b


def _largest_divisor_leq(n, cap):
    """Largest divisor of n (>=1) that is <= cap (>=1)."""
    cap = min(cap, n)
    best = 1
    d = 1
    while d * d <= n:
        if n % d == 0:
            if d <= cap and d > best:
                best = d
            q = n // d
            if q <= cap and q > best:
                best = q
        d += 1
    return best


def _sublane_align(itemsize):
    # Sublane tiling per dtype width: f32 -> 8, bf16 -> 16, int8/fp8 -> 32.
    return 8 * max(1, 4 // max(1, itemsize))


def view(x: jax.Array, *shape: int, tile_byte_budget: int | None = None) -> jax.Array:
    """Equivalent of torch.Tensor.view(*shape)."""
    total = x.size
    out_shape = _resolve_shape(total, shape)
    if total == 0:
        # Nothing to copy; pure metadata.
        return jnp.reshape(x, out_shape)

    budget = int(tile_byte_budget) if tile_byte_budget else _TILE_BYTE_BUDGET
    itemsize = x.dtype.itemsize
    align = _sublane_align(itemsize)

    # ---- choose a lane-dense 2-D layout (rows, cols) for the flat copy ----
    # Cap cols so that an `align`-row tile stays within the byte budget.
    col_cap = max(_LANE, budget // (align * itemsize))
    if total % _LANE == 0:
        d = _largest_divisor_leq(total // _LANE, max(1, col_cap // _LANE))
        cols = _LANE * d                   # multiple of 128 -> unmasked vst
        padded_cols = cols
    else:
        # Odd-numel fallback: widest divisor of numel (lane-masked stores, but
        # still byte-budgeted + row-tiled + pipelined, so large odd inputs
        # can't blow the scoped VMEM limit).
        cols = _largest_divisor_leq(total, col_cap)
        padded_cols = _round_up(cols, _LANE)   # VMEM footprint pads lanes to 128
    rows = total // cols

    # ---- byte-budgeted, dtype-aware row tile ----
    tr = max(align, (budget // (padded_cols * itemsize)) // align * align)
    # Ensure >= _MIN_GRID_STEPS grid steps when the copy is big enough so the
    # "parallel" axis actually shards across v7x's two TensorCores.
    if rows >= _MIN_GRID_STEPS * align:
        tr = min(tr, _round_up(_cdiv(rows, _MIN_GRID_STEPS), align))
    tile_rows = rows if tr >= rows else tr     # full extent is always legal
    grid = (_cdiv(rows, tile_rows),)           # ragged tail handled by Pallas

    # Free layout plumbing: present a lane-dense (rows, cols) slab to the kernel.
    x2d = jnp.reshape(x, (rows, cols))

    # Resident footprint ~ 2 operands x 2 buffers x tile; add headroom.
    vmem_limit = min(32 << 20, max(16 << 20, 4 * budget + (8 << 20)))

    copied = pl.pallas_call(
        _copy_kernel,
        out_shape=jax.ShapeDtypeStruct((rows, cols), x.dtype),
        grid=grid,
        in_specs=[pl.BlockSpec((tile_rows, cols), lambda i: (i, 0))],
        out_specs=pl.BlockSpec((tile_rows, cols), lambda i: (i, 0)),
        input_output_aliases={0: 0},
        cost_estimate=pl.CostEstimate(
            flops=0,
            transcendentals=0,
            bytes_accessed=2 * total * itemsize,
        ),
        compiler_params=pltpu.CompilerParams(
            dimension_semantics=("parallel",),
            vmem_limit_bytes=vmem_limit,
        ),
    )(x2d)

    # The actual `view` is pure shape metadata, no data movement.
    return jnp.reshape(copied, out_shape)


class View:
    """Mirror of the PyTorch module: stores the target shape at construction."""

    def __init__(self, *shape: int):
        self.shape = tuple(shape)

    def __call__(self, x: jax.Array) -> jax.Array:
        return view(x, *self.shape)


if __name__ == "__main__":
    key = jax.random.PRNGKey(0)
    k0, k1, k2 = jax.random.split(key, 3)

    # 1) NCHW-style input; 2*4*16*16 = 2048 elements -> lane-dense (1, 2048) slab.
    x = jax.random.normal(k0, (2, 4, 16, 16), dtype=jnp.float32)
    module = View(2, 4, 256)                       # like x.view(2, 4, 256)
    out = jax.block_until_ready(module(x))
    ref = jnp.reshape(x, (2, 4, 256))
    assert out.shape == (2, 4, 256), out.shape
    assert out.dtype == x.dtype
    assert jnp.array_equal(out, ref)

    # 2) -1 (inferred dim) path of torch.view semantics.
    out2 = jax.block_until_ready(view(x, 2, -1, 16))
    assert out2.shape == (2, 64, 16), out2.shape
    assert jnp.array_equal(out2, jnp.reshape(x, (2, 64, 16)))

    # 3) bf16: dtype-aware (16-sublane aligned) tiling path.
    xb = x.astype(jnp.bfloat16)
    outb = jax.block_until_ready(view(xb, 8, 256))
    assert outb.dtype == jnp.bfloat16
    assert jnp.array_equal(outb, jnp.reshape(xb, (8, 256)))

    # 4) Multi-step grid with a ragged (masked) tail: shrink the byte budget so a
    #    small array exercises the tiled pipeline (rows=36, tile_rows=8, grid=5).
    xm = jax.random.normal(k1, (9, 4, 32, 64), dtype=jnp.float32)
    outm = jax.block_until_ready(view(xm, -1, 2048, tile_byte_budget=64 * 1024))
    assert outm.shape == (36, 2048), outm.shape
    assert jnp.array_equal(outm, jnp.reshape(xm, (36, 2048)))

    # 5) Odd-sized (numel not a multiple of 128) fallback path.
    xo = jax.random.normal(k2, (3, 5, 7), dtype=jnp.float32)
    outo = jax.block_until_ready(view(xo, 105))
    assert outo.shape == (105,), outo.shape
    assert jnp.array_equal(outo, jnp.reshape(xo, (105,)))

    print("KERNEL_OK")
</pallas_src>

<mosaic_0001>
module attributes {stable_mosaic.version = 11 : i64} {
  func.func @_copy_kernel(%arg0: i32, %arg1: memref<1x2048xf32, #tpu.memory_space<vmem>>, %arg2: memref<1x2048xf32, #tpu.memory_space<vmem>>) attributes {dimension_semantics = [#tpu.dimension_semantics<parallel>], iteration_bounds = array<i64: 1>, scalar_prefetch = 0 : i64, scratch_operands = 0 : i64, tpu.core_type = #tpu.core_type<tc>, window_params = [{transform_indices = @transform_0, window_bounds = array<i64: 1, 2048>}, {transform_indices = @transform_1, window_bounds = array<i64: 1, 2048>}]} {
    %c0 = arith.constant 0 : index
    %c0_0 = arith.constant 0 : index
    %0 = vector.load %arg1[%c0, %c0_0] : memref<1x2048xf32, #tpu.memory_space<vmem>>, vector<1x2048xf32>
    %c0_1 = arith.constant 0 : index
    %c0_2 = arith.constant 0 : index
    %1 = vector.load %arg2[%c0_1, %c0_2] : memref<1x2048xf32, #tpu.memory_space<vmem>>, vector<1x2048xf32>
    tpu.vector_store %arg2[%c0_1, %c0_2], %0 {strides = array<i32>} : memref<1x2048xf32, #tpu.memory_space<vmem>>, vector<1x2048xf32>,
    return
  }
  func.func @transform_0(%arg0: i32) -> (i32, i32) {
    %c0_i32 = arith.constant 0 : i32
    %c0_i32_0 = arith.constant 0 : i32
    return %arg0, %c0_i32 : i32, i32
  }
  func.func @transform_1(%arg0: i32) -> (i32, i32) {
    %c0_i32 = arith.constant 0 : i32
    %c0_i32_0 = arith.constant 0 : i32
    return %arg0, %c0_i32 : i32, i32
  }
}

</mosaic_0001>

<bundles_post_ra>
// kernel: tpu_custom_call.1
= control target key start
LH: loop header
LB: loop body
LE: loop exit
PB: predicated region body
PF: predicated region fallthrough
CT: control target
= control target key end

     0   :  { %6 = vsyncpa [#allocation3], 0  ;;  %s116_s0 = inlined_call_operand.hbm [shape: f32[1,2048], index: 0, kind: input, shape index: {}, may-alias: {0,1}]   ;;  %s117_s1 = inlined_call_operand.hbm [shape: f32[1,2048], index: 1, kind: output, shape index: {}, may-alias: {0,1}]  }
   0x1   :  { %7 = vsyncpa [#allocation4], 0  ;;  %s13_s8 = sshll.u32 %s116_s0, 4  ;;  %s98_s9 = smov [#allocation2]   ;;  %s14_s8 = int_to_ptr.hbm [resolvable:$true] %s13_s8 }
   0x2   :  { %s15_s10 = sshll.u32 %s98_s9, 4  ;;  %s16_s10 = int_to_ptr.vmem [resolvable:$true] %s15_s10 }
   0x3   :  { %18 = dma.hbm_to_vmem [thread:$0]  %s14_s8, 256, %s16_s10, [#allocation3]  }
   0x4   :  { %94 = dma.done.wait [#allocation3], 256  }
   0x5   :  { %95 = vsyncadd [#allocation3], 4294967040  ;;  %s99_s11 = smov [#allocation5]   ;;  %s34_s15 = sshll.u32 %s117_s1, 4  ;;  %v23_v0 = vld [vmem:[#allocation2] sm:$0xff]  ;;  %v24_v1 = vld [vmem:[#allocation2 + $0x8] sm:$0xff]  ;;  %s35_s15 = int_to_ptr.hbm [resolvable:$true] %s34_s15 }
   0x6   :  { %s32_s12 = sshll.u32 %s99_s11, 4  ;;  %25 = vst [vmem:[#allocation5] sm:$0xff] %v23_v0  ;;  %s33_s12 = int_to_ptr.vmem [resolvable:$true] %s32_s12 }
   0x7   :  { %26 = vst [vmem:[#allocation5 + $0x8] sm:$0xff] %v24_v1 }
   0x8   :  { %37 = dma.vmem_to_hbm [thread:$0]  %s33_s12, 256, %s35_s15, [#allocation4]  }
   0x9   :  { %96 = dma.done.wait [#allocation4], 256  }
   0xa   :  { %97 = vsyncadd [#allocation4], 4294967040 }
   0xb   :  { %42 = vsyncpa [#allocation3], 1 }
   0xc   :  { %43 = vsyncpa [#allocation4], 1 }

</bundles_post_ra>
